<compile_context>
chip_gen: v5e
topology: v5e:2x2
jax: 0.10.0
libtpu: 0.0.40
codegen_flags: <defaults>
</compile_context>

<pallas_src>
import functools

import jax
import jax.numpy as jnp
from jax.experimental import pallas as pl
from jax.experimental.pallas import tpu as pltpu

BN_EPS = 1e-5  # PyTorch BatchNorm2d default


def conv_bn_relu_kernel(p_ref, w_ref, gb_ref, o_ref, *, n_batch, cout, hw):
    """Fused conv2d (one im2col matmul) + BatchNorm2d (batch stats) + ReLU.

    p_ref  : (Cin*K*K, M) bf16 im2col patch matrix, M = N*H*W (lane-dense)
    w_ref  : (Cout, Cin*K*K) bf16 reshaped conv weights (pure reshape of OIHW)
    gb_ref : (Cout, 2) f32, column 0 = gamma, column 1 = beta
    o_ref  : (N*Cout, H*W) f32 output, row n*Cout+c holds channel c of batch n
    """
    m = n_batch * hw

    # Single MXU contraction, bf16 operands, f32 accumulation.
    conv = jnp.dot(w_ref[...], p_ref[...],
                   preferred_element_type=jnp.float32)          # (Cout, M)

    # BatchNorm2d (training mode): biased batch moments over the N*H*W axis in a
    # single pass (sum + sum-of-squares), folded into a per-channel affine.
    inv_m = 1.0 / m
    s1 = jnp.sum(conv, axis=1, keepdims=True)                   # (Cout, 1)
    s2 = jnp.sum(conv * conv, axis=1, keepdims=True)            # (Cout, 1)
    mean = s1 * inv_m
    var = jnp.maximum(s2 * inv_m - mean * mean, 0.0)            # clamp: no NaN via rsqrt
    gamma = gb_ref[:, 0:1]                                      # (Cout, 1)
    beta = gb_ref[:, 1:2]                                       # (Cout, 1)
    scale = gamma * jax.lax.rsqrt(var + BN_EPS)                 # EUP slot
    shift = beta - mean * scale

    # Fused BN-affine + ReLU over the lane-dense slab.
    y = jnp.maximum(conv * scale + shift, 0.0)                  # (Cout, M)

    # Emit in (N*Cout, H*W) layout: two aligned (Cout, hw) vreg copies, so the
    # wrapper's final output transpose becomes a free reshape.
    for n in range(n_batch):  # static Python loop (N=2), static slices
        o_ref[n * cout:(n + 1) * cout, :] = y[:, n * hw:(n + 1) * hw]


def conv_relu_forward(x_nchw, weight, bias, gamma, beta, kernel_size):
    """x_nchw: (N, Cin, H, W); weight: (Cout, Cin, K, K) -- PyTorch conventions."""
    N, Cin, H, W = x_nchw.shape
    Cout = weight.shape[0]
    K = kernel_size
    pad = (K - 1) // 2
    HW = H * W
    M = N * HW
    KKC = Cin * K * K

    # Conv bias intentionally unused: training-mode BN subtracts the batch mean,
    # which contains the bias, so it cancels exactly.
    del bias

    # --- wrapper-side glue (few cheap XLA ops) ---
    # NCHW-order im2col: pad spatially, slice taps, shuffle only the small leading
    # axes (moves contiguous H*W blocks; no lane-crossing transpose of the slab).
    xp = jnp.pad(x_nchw.astype(jnp.float32),
                 ((0, 0), (0, 0), (pad, pad), (pad, pad)))       # (N, Cin, H+2p, W+2p)
    taps = [xp[:, :, kh:kh + H, kw:kw + W]
            for kh in range(K) for kw in range(K)]               # each (N, Cin, H, W)
    patches = jnp.stack(taps, axis=0)                            # (K*K, N, Cin, H, W)
    patches = jnp.transpose(patches, (2, 0, 1, 3, 4))            # (Cin, K*K, N, H, W)
    patches = patches.reshape(KKC, M).astype(jnp.bfloat16)       # rows = (cin, kh, kw)

    # Pure reshape: weight[cout, cin, kh, kw] -> (Cout, Cin*K*K), same row order.
    w_mat = weight.reshape(Cout, KKC).astype(jnp.bfloat16)
    # gamma/beta packed into one input: one DMA, one VMEM buffer.
    gb = jnp.stack([gamma, beta], axis=1).astype(jnp.float32)    # (Cout, 2)

    kernel = functools.partial(conv_bn_relu_kernel, n_batch=N, cout=Cout, hw=HW)

    cost = pl.CostEstimate(
        flops=2 * Cout * KKC * M,
        transcendentals=Cout,
        bytes_accessed=(patches.size * 2 + w_mat.size * 2
                        + gb.size * 4 + Cout * M * 4),
    )

    # Tiny problem -> single gridless invocation, everything resident in VMEM.
    out_2d = pl.pallas_call(
        kernel,
        out_shape=jax.ShapeDtypeStruct((N * Cout, HW), jnp.float32),
        in_specs=[pl.BlockSpec(memory_space=pltpu.MemorySpace.VMEM)] * 3,
        out_specs=pl.BlockSpec(memory_space=pltpu.MemorySpace.VMEM),
        cost_estimate=cost,
    )(patches, w_mat, gb)

    # (N*Cout, H*W) -> (N, Cout, H, W): free reshape, no transpose launch.
    return out_2d.reshape(N, Cout, H, W)


def _reference(x_nchw, weight, bias, gamma, beta, kernel_size):
    """Pure-JAX f32 reference matching PyTorch Conv2d + BatchNorm2d(train) + ReLU."""
    pad = (kernel_size - 1) // 2
    conv = jax.lax.conv_general_dilated(
        x_nchw, weight, window_strides=(1, 1),
        padding=[(pad, pad), (pad, pad)],
        dimension_numbers=("NCHW", "OIHW", "NCHW"))
    conv = conv + bias[None, :, None, None]
    mean = jnp.mean(conv, axis=(0, 2, 3), keepdims=True)
    var = jnp.mean((conv - mean) ** 2, axis=(0, 2, 3), keepdims=True)
    y = (conv - mean) * jax.lax.rsqrt(var + BN_EPS)
    y = y * gamma[None, :, None, None] + beta[None, :, None, None]
    return jnp.maximum(y, 0.0)


if __name__ == "__main__":
    # Small, module-consistent shapes: batch=2, in_channels=4, out_channels=8,
    # spatial=16x16, kernel_size=3.
    N, Cin, Cout, H, W, K = 2, 4, 8, 16, 16, 3

    key = jax.random.PRNGKey(0)
    kx, kw, kb = jax.random.split(key, 3)

    x = jax.random.normal(kx, (N, Cin, H, W), dtype=jnp.float32)
    # Deterministic synthetic params (shapes match nn.Conv2d / nn.BatchNorm2d).
    weight = jax.random.normal(kw, (Cout, Cin, K, K), dtype=jnp.float32) * 0.1
    bias = jax.random.normal(kb, (Cout,), dtype=jnp.float32) * 0.1
    gamma = jnp.ones((Cout,), dtype=jnp.float32)   # BatchNorm2d default init
    beta = jnp.zeros((Cout,), dtype=jnp.float32)   # BatchNorm2d default init

    out = conv_relu_forward(x, weight, bias, gamma, beta, K)
    out = jax.block_until_ready(out)

    ref = _reference(x, weight, bias, gamma, beta, K)
    assert out.shape == (N, Cout, H, W)
    # Tolerance loosened vs. the f32 reference because the MXU operands are bf16
    # (contraction depth 36, f32 accumulation -> max abs error ~1e-2 after BN).
    assert jnp.allclose(out, ref, atol=5e-2, rtol=2e-2), "mismatch vs JAX reference"

    print("KERNEL_OK")
</pallas_src>

<mosaic_0001>
module attributes {stable_mosaic.version = 11 : i64} {
  func.func @conv_bn_relu_kernel(%arg0: memref<36x512xbf16, #tpu.memory_space<vmem>>, %arg1: memref<8x36xbf16, #tpu.memory_space<vmem>>, %arg2: memref<8x2xf32, #tpu.memory_space<vmem>>, %arg3: memref<16x256xf32, #tpu.memory_space<vmem>>) attributes {dimension_semantics = [], scalar_prefetch = 0 : i64, scratch_operands = 0 : i64, tpu.core_type = #tpu.core_type<tc>} {
    %c0 = arith.constant 0 : index
    %c0_0 = arith.constant 0 : index
    %0 = vector.load %arg1[%c0, %c0_0] : memref<8x36xbf16, #tpu.memory_space<vmem>>, vector<8x36xbf16>
    %c0_1 = arith.constant 0 : index
    %c0_2 = arith.constant 0 : index
    %1 = vector.load %arg0[%c0_1, %c0_2] : memref<36x512xbf16, #tpu.memory_space<vmem>>, vector<36x512xbf16>
    %cst = arith.constant dense<0.000000e+00> : vector<8x512xf32>
    %2 = tpu.matmul %0, %1, %cst {dimension_numbers = #tpu.dot_dimension_numbers<[1], [0], [0], [1], [0, 0, 1, 1], [], []>} : vector<8x36xbf16>, vector<36x512xbf16>, vector<8x512xf32> -> vector<8x512xf32>
    %cst_3 = arith.constant dense<0.000000e+00> : vector<8xf32>
    %3 = vector.multi_reduction <add>, %2, %cst_3 [1] : vector<8x512xf32> to vector<8xf32>
    %4 = vector.shape_cast %3 : vector<8xf32> to vector<8x1xf32>
    %5 = arith.mulf %2, %2 : vector<8x512xf32>
    %cst_4 = arith.constant dense<0.000000e+00> : vector<8xf32>
    %6 = vector.multi_reduction <add>, %5, %cst_4 [1] : vector<8x512xf32> to vector<8xf32>
    %7 = vector.shape_cast %6 : vector<8xf32> to vector<8x1xf32>
    %cst_5 = arith.constant 0.001953125 : f32
    %8 = vector.broadcast %cst_5 : f32 to vector<8x1xf32>
    %9 = arith.mulf %4, %8 : vector<8x1xf32>
    %cst_6 = arith.constant 0.001953125 : f32
    %10 = vector.broadcast %cst_6 : f32 to vector<8x1xf32>
    %11 = arith.mulf %7, %10 : vector<8x1xf32>
    %12 = arith.mulf %9, %9 : vector<8x1xf32>
    %13 = arith.subf %11, %12 : vector<8x1xf32>
    %cst_7 = arith.constant 0.000000e+00 : f32
    %14 = vector.broadcast %cst_7 : f32 to vector<8x1xf32>
    %15 = arith.maximumf %13, %14 : vector<8x1xf32>
    %c0_8 = arith.constant 0 : index
    %c0_9 = arith.constant 0 : index
    %16 = vector.load %arg2[%c0_8, %c0_9] : memref<8x2xf32, #tpu.memory_space<vmem>>, vector<8x1xf32>
    %c0_10 = arith.constant 0 : index
    %c1 = arith.constant 1 : index
    %17 = vector.load %arg2[%c0_10, %c1] : memref<8x2xf32, #tpu.memory_space<vmem>>, vector<8x1xf32>
    %cst_11 = arith.constant 9.99999974E-6 : f32
    %18 = vector.broadcast %cst_11 : f32 to vector<8x1xf32>
    %19 = arith.addf %15, %18 : vector<8x1xf32>
    %20 = math.rsqrt %19 : vector<8x1xf32>
    %21 = arith.mulf %16, %20 : vector<8x1xf32>
    %22 = arith.mulf %9, %21 : vector<8x1xf32>
    %23 = arith.subf %17, %22 : vector<8x1xf32>
    %24 = vector.broadcast %21 : vector<8x1xf32> to vector<8x512xf32>
    %25 = arith.mulf %2, %24 : vector<8x512xf32>
    %26 = vector.broadcast %23 : vector<8x1xf32> to vector<8x512xf32>
    %27 = arith.addf %25, %26 : vector<8x512xf32>
    %cst_12 = arith.constant 0.000000e+00 : f32
    %28 = vector.broadcast %cst_12 : f32 to vector<8x512xf32>
    %29 = arith.maximumf %27, %28 : vector<8x512xf32>
    %30 = vector.extract_strided_slice %29 {offsets = [0, 0], sizes = [8, 256], strides = [1, 1]} : vector<8x512xf32> to vector<8x256xf32>
    %c0_13 = arith.constant 0 : index
    %c0_14 = arith.constant 0 : index
    %31 = vector.load %arg3[%c0_13, %c0_14] : memref<16x256xf32, #tpu.memory_space<vmem>>, vector<8x256xf32>
    tpu.vector_store %arg3[%c0_13, %c0_14], %30 {strides = array<i32>} : memref<16x256xf32, #tpu.memory_space<vmem>>, vector<8x256xf32>,
    %32 = vector.extract_strided_slice %29 {offsets = [0, 256], sizes = [8, 256], strides = [1, 1]} : vector<8x512xf32> to vector<8x256xf32>
    %c8 = arith.constant 8 : index
    %c0_15 = arith.constant 0 : index
    %33 = vector.load %arg3[%c8, %c0_15] : memref<16x256xf32, #tpu.memory_space<vmem>>, vector<8x256xf32>
    tpu.vector_store %arg3[%c8, %c0_15], %32 {strides = array<i32>} : memref<16x256xf32, #tpu.memory_space<vmem>>, vector<8x256xf32>,
    return
  }
}

</mosaic_0001>

<bundles_post_ra>
// kernel: tpu_custom_call.1
= control target key start
LH: loop header
LB: loop body
LE: loop exit
PB: predicated region body
PF: predicated region fallthrough
CT: control target
= control target key end

     0   :  { %8 = vsyncpa [#allocation3], 0  ;;  %s402_s0 = inlined_call_operand.hbm [shape: bf16[36,512], index: 0, kind: input, shape index: {}]   ;;  %s403_s1 = inlined_call_operand.vmem [shape: bf16[8,36], index: 1, kind: input, shape index: {}]   ;;  %s404_s2 = inlined_call_operand.vmem [shape: f32[8,2], index: 2, kind: input, shape index: {}]   ;;  %s405_s3 = inlined_call_operand.hbm [shape: f32[16,256], index: 3, kind: output, shape index: {}]  }
   0x1   :  { %9 = vsyncpa [#allocation4], 0  ;;  %s14_s14 = sshll.u32 %s402_s0, 4  ;;  %s353_s15 = smov [#allocation2]   ;;  %s15_s14 = int_to_ptr.hbm [resolvable:$true] %s14_s14 }
   0x2   :  { %s16_s16 = sshll.u32 %s353_s15, 4  ;;  %s354_s17 = smov 256   ;;  %s17_s16 = int_to_ptr.vmem [resolvable:$true] %s16_s16 }
   0x3   :  { %s355_s18 = smov 16  }
   0x4   :  { %22 = dma.hbm_to_vmem [thread:$0]  %s15_s14, 1280, %s17_s16, [#allocation3], %s354_s17, %s354_s17, %s355_s18  }
   0x5   :  { %349 = dma.done.wait [#allocation3], 1280  }
   0x6   :  { %350 = vsyncadd [#allocation3], 4294966016  ;;  %v41_v0 = vld [vmem:[#allocation2 + $0x40] sm:$0x33]  ;;  %v42_v1 = vld [vmem:[#allocation2 + $0x48] sm:$0x33] }
   0x7   :  { %v69_v2 = vunpack.c.l.b16 %v41_v0  ;;  %v70_v3 = vunpack.c.h.b16 %v41_v0  ;;  %v71_v4 = vunpack.c.l.b16 %v42_v1  ;;  %v72_v5 = vunpack.c.h.b16 %v42_v1  ;;  %v263_v6 = vld [vmem:[#allocation2 + $0x20] sm:$0xf]  ;;  %v287_v7 = vld [vmem:[#allocation2 + $0x2c] sm:$0xf0]  ;;  %v285_v12 = vld [vmem:[#allocation2 + $0x24] sm:$0xf] }
   0x8   :  { %vm97_vm0 = vcmask 1041408   ;;  %v265_v13 = vld [vmem:[#allocation2 + $0x30] sm:$0xf0]  ;;  %v271_v14 = vld [vmem:[#allocation2 + $0x28] sm:$0xf]  ;;  %v264_v22 = vor.u32 %v287_v7, %v263_v6  ;;  %vm93_vm1 = vcmask 293888  }
   0x9   :  { %v81_v8 = vpack.c.b16 %v69_v2, %v69_v2  ;;  %v82_v9 = vpack.c.b16 %v70_v3, %v70_v3  ;;  %v83_v10 = vpack.c.b16 %v71_v4, %v71_v4  ;;  %v84_v11 = vpack.c.b16 %v72_v5, %v72_v5  ;;  %v288_v15 = vld [vmem:[#allocation2 + $0x34] sm:$0xf0]  ;;  %v286_v16 = vld [vmem:[#allocation2 + $0x2c] sm:$0xf]  ;;  %v273_v17 = vld [vmem:[#allocation2 + $0x38] sm:$0xf0] }
   0xa   :  { %v268_v23 = vor.u32 %v285_v12, %v265_v13  ;;  %v247_v24 = vld [vmem:[#allocation2] sm:$0xf]  ;;  %v283_v25 = vld [vmem:[#allocation2 + $0xc] sm:$0xf0]  ;;  %v272_v26 = vor.u32 %v288_v15, %v271_v14  ;;  %v276_v27 = vor.u32 %v286_v16, %v273_v17  ;;  %v281_v28 = vld [vmem:[#allocation2 + $0x4] sm:$0xf] }
   0xb   :  { %v99_v18 = vsel %vm97_vm0, %v81_v8, 0  ;;  %v102_v19 = vsel %vm97_vm0, %v82_v9, 0  ;;  %v105_v20 = vsel %vm97_vm0, %v83_v10, 0  ;;  %v108_v21 = vsel %vm97_vm0, %v84_v11, 0  ;;  %v249_v29 = vld [vmem:[#allocation2 + $0x10] sm:$0xf0] }
   0xc   :  { %115 = vmatpush.bf16.msra.mxu0 %v99_v18  ;;  %128 = vmatpush.bf16.msra.mxu1 %v102_v19  ;;  %v255_v30 = vld [vmem:[#allocation2 + $0x8] sm:$0xf]  ;;  %v284_v31 = vld [vmem:[#allocation2 + $0x14] sm:$0xf0]  ;;  %v282_v32 = vld [vmem:[#allocation2 + $0xc] sm:$0xf]  ;;  %v248_v34 = vor.u32 %v283_v25, %v247_v24  ;;  %v252_v35 = vor.u32 %v281_v28, %v249_v29 }
   0xd   :  { %141 = vmatpush.bf16.msra.mxu2 %v105_v20  ;;  %154 = vmatpush.bf16.msra.mxu3 %v108_v21  ;;  %v257_v33 = vld [vmem:[#allocation2 + $0x18] sm:$0xf0]  ;;  %v256_v36 = vor.u32 %v284_v31, %v255_v30  ;;  %v32_v38 = vld [vmem:[%s403_s1] sm:$0xf]  ;;  %v356_v60 = vmov 0   ;;  %s357_s21 = smov 1  }
   0xe   :  { %v260_v37 = vor.u32 %v282_v32, %v257_v33  ;;  %296 = vset.pattern.permute.xlu1 %v356_v60  ;;  %v181_v7 = vld [vmem:[%s404_s2] sm:$0xff]  ;;  %v358_v12 = vmov 1   ;;  %s359_s2 = smov [#allocation5]   ;;  %s232_s25 = sshll.u32 %s405_s3, 4  ;;  %s233_s25 = int_to_ptr.hbm [resolvable:$true] %s232_s25 }
   0xf   :  { %297 = vset.pattern.permute.xlu2 %v358_v12  ;;  %298 = vset.pattern.permute.xlu0 %v358_v12  ;;  %s230_s22 = sshll.u32 %s359_s2, 4  ;;  %s231_s22 = int_to_ptr.vmem [resolvable:$true] %s230_s22 }
  0x10   :  { %116 = vmatpush.bf16.msra.mxu0 %v264_v22  ;;  %129 = vmatpush.bf16.msra.mxu1 %v268_v23 }
  0x11   :  { %142 = vmatpush.bf16.msra.mxu2 %v272_v26  ;;  %155 = vmatpush.bf16.msra.mxu3 %v276_v27 }
  0x14   :  { %117 = vmatpush.bf16.msra.mxu0 %v248_v34  ;;  %130 = vmatpush.bf16.msra.mxu1 %v252_v35 }
  0x15   :  { %143 = vmatpush.bf16.msra.mxu2 %v256_v36  ;;  %156 = vmatpush.bf16.msra.mxu3 %v260_v37 }
  0x17   :  { %277 = vmatmul.msk.bf16.vlgmr.msra.gmra.mxu0 %vm93_vm1, %v32_v38  ;;  %278 = vmatmul.msk.bf16.vlgmr.msra.gmra.mxu1 %vm93_vm1, %v32_v38 }
  0x18   :  { %279 = vmatmul.msk.bf16.vlgmr.msra.gmra.mxu2 %vm93_vm1, %v32_v38  ;;  %280 = vmatmul.msk.bf16.vlgmr.msra.gmra.mxu3 %vm93_vm1, %v32_v38 }
  0x94   :  { %v119_v39 = vpop.f32.mrf.mxu0  ;;  %v132_v40 = vpop.f32.mrf.mxu1 }
  0x95   :  { %v162_v41 = vadd.f32 %v132_v40, %v119_v39  ;;  %v167_v42 = vmul.f32 %v119_v39, %v119_v39  ;;  %v168_v43 = vmul.f32 %v132_v40, %v132_v40 }
  0x97   :  { %v171_v51 = vadd.f32 %v168_v43, %v167_v42 }
  0x9b   :  { %v145_v44 = vpop.f32.mrf.mxu2  ;;  %v158_v45 = vpop.f32.mrf.mxu3 }
  0x9c   :  { %v121_v46 = vpop.f32.mrf.mxu0  ;;  %v134_v47 = vpop.f32.mrf.mxu1  ;;  %v163_v48 = vadd.f32 %v162_v41, %v145_v44  ;;  %v169_v49 = vmul.f32 %v145_v44, %v145_v44  ;;  %v170_v52 = vmul.f32 %v158_v45, %v158_v45 }
  0x9e   :  { %v164_v50 = vadd.f32 %v163_v48, %v158_v45  ;;  %v172_v53 = vadd.f32 %v171_v51, %v169_v49 }
  0xa0   :  { %165 = vadd.xlane.f32.xlu0 %v164_v50  ;;  %v173_v56 = vadd.f32 %v172_v53, %v170_v52 }
  0xa3   :  { %v147_v54 = vpop.f32.mrf.mxu2  ;;  %v160_v55 = vpop.f32.mrf.mxu3 }
  0xa8   :  { %174 = vadd.xlane.f32.xlu0 %v173_v56 }
 0x113   :  { %v166_v57 = vpop.xlane.xlu0 %165 }
 0x114   :  { %v176_v58 = vmul.f32 0.001953125, %v166_v57 }
 0x116   :  { %v178_v61 = vmul.f32 %v176_v58, %v176_v58 }
 0x11b   :  { %v175_v59 = vpop.xlane.xlu0 %174 }
 0x11c   :  { %v177_v62 = vmul.f32 0.001953125, %v175_v59 }
 0x11e   :  { %v179_v63 = vsub.f32 %v177_v62, %v178_v61 }
 0x120   :  { %v180_v0 = vmax.f32 %v179_v63, 0.0 }
 0x122   :  { %v182_v1 = vadd.f32 1e-05, %v180_v0 }
 0x124   :  { %299 = vrsqrt.f32 %v182_v1  ;;  %vm189_vm3 = vweird.f32 %v182_v1 }
 0x12a   :  { %v300_v2 = vpop.eup %299 }
 0x12b   :  { %v184_v3 = vmul.f32 %v300_v2, %v182_v1  ;;  %vm190_vm2 = vweird.f32 %v300_v2 }
 0x12c   :  { %vm191_vm4 = vmor %vm189_vm3, %vm190_vm2 }
 0x12d   :  { %v185_v4 = vmul.f32 %v300_v2, %v184_v3 }
 0x12f   :  { %v186_v5 = vmul.f32 0.5, %v185_v4 }
 0x131   :  { %v187_v6 = vsub.f32 1.5, %v186_v5 }
 0x133   :  { %v188_v8 = vmul.f32 %v300_v2, %v187_v6 }
 0x135   :  { %v192_v9 = vsel %vm191_vm4, %v300_v2, %v188_v8 }
 0x136   :  { %v193_v10 = vmul.f32 %v192_v9, %v181_v7 }
 0x138   :  { %v194_v11 = vmul.f32 %v193_v10, %v176_v58 }
 0x13a   :  { %196 = vrot.lane.b32.xlu1 %v194_v11, %s357_s21 }
 0x142   :  { %202 = vperm.xlu1 %296, %v193_v10  }
 0x1ac   :  { %v197_v13 = vpop.permute.xlu1 %196 }
 0x1ad   :  { %v199_v14 = vsub.f32 %v181_v7, %v197_v13 }
 0x1af   :  { %211 = vperm.xlu2 %297, %v199_v14  }
 0x1b4   :  { %v203_v15 = vpop.permute.xlu1 %202 }
 0x1b5   :  { %v205_v16 = vmul.f32 %v203_v15, %v119_v39  ;;  %v206_v17 = vmul.f32 %v203_v15, %v132_v40  ;;  %v207_v18 = vmul.f32 %v203_v15, %v145_v44  ;;  %v208_v19 = vmul.f32 %v203_v15, %v158_v45 }
 0x209   :  { %v212_v20 = vpop.permute.xlu2 %211 }
 0x20a   :  { %v214_v21 = vadd.f32 %v212_v20, %v205_v16  ;;  %v215_v22 = vadd.f32 %v212_v20, %v206_v17  ;;  %v216_v23 = vadd.f32 %v212_v20, %v207_v18  ;;  %v217_v24 = vadd.f32 %v212_v20, %v208_v19 }
 0x20c   :  { %v218_v25 = vmax.f32 %v214_v21, 0.0  ;;  %v219_v26 = vmax.f32 %v215_v22, 0.0  ;;  %v220_v27 = vmax.f32 %v216_v23, 0.0  ;;  %v221_v28 = vmax.f32 %v217_v24, 0.0 }
 0x20e   :  { %222 = vst [vmem:[#allocation5] sm:$0xff] %v218_v25 }
 0x20f   :  { %223 = vst [vmem:[#allocation5 + $0x8] sm:$0xff] %v219_v26 }
 0x210   :  { %224 = vst [vmem:[#allocation5 + $0x10] sm:$0xff] %v220_v27 }
 0x211   :  { %225 = vst [vmem:[#allocation5 + $0x18] sm:$0xff] %v221_v28 }
 0x212   :  { %238 = dma.vmem_to_hbm [thread:$0]  %s231_s22, 512, %s233_s25, [#allocation4], %s354_s17, %s354_s17, %s355_s18  }
 0x213   :  { %351 = dma.done.wait [#allocation4], 512  }
 0x214   :  { %352 = vsyncadd [#allocation4], 4294966784 }
 0x215   :  { %243 = vsyncpa [#allocation3], 1 }
 0x216   :  { %244 = vsyncpa [#allocation4], 1 }

</bundles_post_ra>
